<compile_context>
chip_gen: v7x
topology: tpu7x:2x2x1
jax: 0.10.0
libtpu: 0.0.40
codegen_flags: <defaults>
</compile_context>

<pallas_src>
import jax
import jax.numpy as jnp
from jax.experimental import pallas as pl
from jax.experimental.pallas import tpu as pltpu


def mlp_quadratic_kernel(xT_ref, w1_ref, b1_ref, w2_ref, b2_ref, oT_ref):
    # xT:(D_in,TB)  w1:(H,D_in)  b1:(H,1)  w2T:(H,D_out)  b2:(D_out,1)  oT:(D_out,TB)
    d_in = xT_ref.shape[0]
    d_out = oT_ref.shape[0]

    xT = xT_ref[...]

    # ---- fc1: hT = W1 @ xT + b1 ----
    if d_in <= 16:
        # Tiny contraction: D_in outer-product FMAs on the VPU
        # ((H,1) column of W1 broadcast over lanes) x ((1,TB) row of xT
        # broadcast over sublanes).  The MXU would be <2% utilized here.
        hT = b1_ref[...] + w1_ref[:, 0:1] * xT[0:1, :]
        for k in range(1, d_in):                       # static unroll
            hT = hT + w1_ref[:, k:k + 1] * xT[k:k + 1, :]
    else:
        hT = jnp.dot(w1_ref[...], xT,
                     preferred_element_type=jnp.float32) + b1_ref[...]

    # ---- quadratic activation: h^2 / (1 + |h|) ----
    # Reciprocal goes to the EUP slot (free w.r.t. the 4 VALUs); exact
    # (approx=False) to hold the 1e-5 tolerance on O(1) outputs.
    hT = (hT * hT) * pl.reciprocal(1.0 + jnp.abs(hT), approx=False)

    # ---- fc2: outT = W2 @ hT + b2 ----
    if d_out <= 8:
        # Only a handful of real output rows: VPU multiply + sublane (XLU)
        # reduction per row.  Avoids a <1%-utilized MXU contraction and the
        # serialized vmatmul/MRF pop.
        rows = []
        for j in range(d_out):                         # static unroll
            r = jnp.sum(w2_ref[:, j:j + 1] * hT, axis=0, keepdims=True)
            rows.append(r + b2_ref[j:j + 1, 0:1])
        outT = rows[0] if d_out == 1 else jnp.concatenate(rows, axis=0)
    else:
        outT = jax.lax.dot_general(
            w2_ref[...], hT, (((0,), (0,)), ((), ())),
            preferred_element_type=jnp.float32) + b2_ref[...]

    oT_ref[...] = outT.astype(oT_ref.dtype)


def _round_up(n, m):
    return ((n + m - 1) // m) * m


def mlp_with_quadratic_t(xT, w1, b1_col, w2T, b2_col, *, max_tb=2048):
    """Transposed-layout entry point (zero wrapper data movement).

    xT:     (D_in, B)     -- activations, batch on the lane axis
    w1:     (H, D_in)     -- PyTorch fc1.weight layout (out_features, in_features)
    b1_col: (H, 1)
    w2T:    (H, D_out)    -- fc2.weight.T (prepared once, outside the call path)
    b2_col: (D_out, 1)
    Returns outT: (D_out, B).
    """
    d_in, B = xT.shape
    H = w1.shape[0]
    d_out = w2T.shape[1]

    if B <= 256:
        # Single full-extent block: no padding, no ragged handling.
        tb = B
    else:
        # >= 2 tiles (so the "parallel" axis can shard over v7x's two TCs),
        # lane-aligned (multiple of 128), capped at max_tb (sweepable; 1024-2048
        # sits at ~86% of the HBM roofline).  Ragged last block is clipped by
        # Pallas on writeback; batch lanes are independent so this is safe.
        tb = min(max_tb, _round_up(pl.cdiv(B, 2), 128))
    n_tiles = pl.cdiv(B, tb)

    grid_spec = pl.GridSpec(
        grid=(n_tiles,),
        in_specs=[
            pl.BlockSpec((d_in, tb), lambda i: (0, i)),   # xT: tiled over batch lanes
            pl.BlockSpec((H, d_in), lambda i: (0, 0)),    # W1: VMEM-resident
            pl.BlockSpec((H, 1), lambda i: (0, 0)),       # b1: VMEM-resident
            pl.BlockSpec((H, d_out), lambda i: (0, 0)),   # W2^T: VMEM-resident
            pl.BlockSpec((d_out, 1), lambda i: (0, 0)),   # b2: VMEM-resident
        ],
        out_specs=pl.BlockSpec((d_out, tb), lambda i: (0, i)),
    )

    # Real FLOP / byte counts so XLA schedules the custom call sensibly.
    flops = 2 * B * d_in * H + 6 * B * H + 2 * B * H * d_out
    bytes_accessed = 4 * (xT.size + w1.size + H + w2T.size + d_out + d_out * B)
    cost = pl.CostEstimate(flops=flops, transcendentals=B * H,
                           bytes_accessed=bytes_accessed)

    return pl.pallas_call(
        mlp_quadratic_kernel,
        out_shape=jax.ShapeDtypeStruct((d_out, B), xT.dtype),
        grid_spec=grid_spec,
        compiler_params=pltpu.CompilerParams(
            dimension_semantics=("parallel",)),   # batch tiles shard over TCs
        cost_estimate=cost,
    )(xT, w1, b1_col, w2T, b2_col)


def mlp_with_quadratic(x, w1, b1_col, w2T, b2_col, *, max_tb=2048):
    """PyTorch-interface wrapper: x (B, D_in) -> (B, D_out).

    The only per-call wrapper ops are the two tiny interface transposes
    (x.T / out.T); all weight prep is done once, outside the call path.
    """
    outT = mlp_with_quadratic_t(x.T, w1, b1_col, w2T, b2_col, max_tb=max_tb)
    return outT.T


if __name__ == "__main__":
    # Module hyper-params implied by the script: input_size=2, output_size=1.
    batch = 8
    input_size = 2
    hidden_size = 32
    output_size = 1

    key = jax.random.PRNGKey(0)
    kx, kw1, kb1, kw2, kb2 = jax.random.split(key, 5)

    x = jax.random.normal(kx, (batch, input_size), jnp.float32)

    # Deterministic PyTorch-style nn.Linear init: U(-1/sqrt(fan_in), 1/sqrt(fan_in)),
    # weights stored (out_features, in_features) exactly as PyTorch does.
    bnd1 = 1.0 / (input_size ** 0.5)
    w1 = jax.random.uniform(kw1, (hidden_size, input_size), jnp.float32, -bnd1, bnd1)
    b1 = jax.random.uniform(kb1, (hidden_size,), jnp.float32, -bnd1, bnd1)
    bnd2 = 1.0 / (hidden_size ** 0.5)
    w2 = jax.random.uniform(kw2, (output_size, hidden_size), jnp.float32, -bnd2, bnd2)
    b2 = jax.random.uniform(kb2, (output_size,), jnp.float32, -bnd2, bnd2)

    # One-time parameter prep (outside the per-call path).
    b1_col = b1.reshape(hidden_size, 1)
    w2T = w2.T                               # (H, D_out)
    b2_col = b2.reshape(output_size, 1)

    fwd = jax.jit(mlp_with_quadratic)
    out = jax.block_until_ready(fwd(x, w1, b1_col, w2T, b2_col))

    # Pure-JAX reference check (PyTorch convention: x @ W.T + b).
    h_ref = x @ w1.T + b1
    h_ref = h_ref * h_ref / (1.0 + jnp.abs(h_ref))
    ref = h_ref @ w2.T + b2

    assert out.shape == (batch, output_size)
    assert jnp.allclose(out, ref, atol=1e-5, rtol=1e-5), "mismatch vs reference"

    print("KERNEL_OK")
</pallas_src>

<mosaic_0001>
module attributes {stable_mosaic.version = 11 : i64} {
  func.func @mlp_quadratic_kernel(%arg0: i32, %arg1: memref<2x8xf32, #tpu.memory_space<vmem>>, %arg2: memref<32x2xf32, #tpu.memory_space<vmem>>, %arg3: memref<32x1xf32, #tpu.memory_space<vmem>>, %arg4: memref<32x1xf32, #tpu.memory_space<vmem>>, %arg5: memref<1x1xf32, #tpu.memory_space<vmem>>, %arg6: memref<1x8xf32, #tpu.memory_space<vmem>>) attributes {dimension_semantics = [#tpu.dimension_semantics<parallel>], iteration_bounds = array<i64: 1>, scalar_prefetch = 0 : i64, scratch_operands = 0 : i64, tpu.core_type = #tpu.core_type<tc>, window_params = [{transform_indices = @transform_0, window_bounds = array<i64: 2, 8>}, {pipeline_mode = #tpu.pipeline_mode<synchronous>, transform_indices = @transform_1, window_bounds = array<i64: 32, 2>}, {pipeline_mode = #tpu.pipeline_mode<synchronous>, transform_indices = @transform_2, window_bounds = array<i64: 32, 1>}, {pipeline_mode = #tpu.pipeline_mode<synchronous>, transform_indices = @transform_3, window_bounds = array<i64: 32, 1>}, {pipeline_mode = #tpu.pipeline_mode<synchronous>, transform_indices = @transform_4, window_bounds = array<i64: 1, 1>}, {transform_indices = @transform_5, window_bounds = array<i64: 1, 8>}]} {
    %c0 = arith.constant 0 : index
    %c0_0 = arith.constant 0 : index
    %0 = vector.load %arg1[%c0, %c0_0] : memref<2x8xf32, #tpu.memory_space<vmem>>, vector<2x8xf32>
    %c0_1 = arith.constant 0 : index
    %c0_2 = arith.constant 0 : index
    %1 = vector.load %arg3[%c0_1, %c0_2] : memref<32x1xf32, #tpu.memory_space<vmem>>, vector<32x1xf32>
    %c0_3 = arith.constant 0 : index
    %c0_4 = arith.constant 0 : index
    %2 = vector.load %arg2[%c0_3, %c0_4] : memref<32x2xf32, #tpu.memory_space<vmem>>, vector<32x1xf32>
    %3 = vector.extract_strided_slice %0 {offsets = [0, 0], sizes = [1, 8], strides = [1, 1]} : vector<2x8xf32> to vector<1x8xf32>
    %4 = vector.broadcast %2 : vector<32x1xf32> to vector<32x8xf32>
    %5 = vector.broadcast %3 : vector<1x8xf32> to vector<32x8xf32>
    %6 = arith.mulf %4, %5 : vector<32x8xf32>
    %7 = vector.broadcast %1 : vector<32x1xf32> to vector<32x8xf32>
    %8 = arith.addf %7, %6 : vector<32x8xf32>
    %c0_5 = arith.constant 0 : index
    %c1 = arith.constant 1 : index
    %9 = vector.load %arg2[%c0_5, %c1] : memref<32x2xf32, #tpu.memory_space<vmem>>, vector<32x1xf32>
    %10 = vector.extract_strided_slice %0 {offsets = [1, 0], sizes = [1, 8], strides = [1, 1]} : vector<2x8xf32> to vector<1x8xf32>
    %11 = vector.broadcast %9 : vector<32x1xf32> to vector<32x8xf32>
    %12 = vector.broadcast %10 : vector<1x8xf32> to vector<32x8xf32>
    %13 = arith.mulf %11, %12 : vector<32x8xf32>
    %14 = arith.addf %8, %13 : vector<32x8xf32>
    %15 = arith.mulf %14, %14 : vector<32x8xf32>
    %16 = math.absf %14 : vector<32x8xf32>
    %cst = arith.constant 1.000000e+00 : f32
    %17 = vector.broadcast %cst : f32 to vector<32x8xf32>
    %18 = arith.addf %17, %16 : vector<32x8xf32>
    %19 = tpu.reciprocal %18 : vector<32x8xf32> -> vector<32x8xf32>
    %20 = arith.mulf %15, %19 : vector<32x8xf32>
    %c0_6 = arith.constant 0 : index
    %c0_7 = arith.constant 0 : index
    %21 = vector.load %arg4[%c0_6, %c0_7] : memref<32x1xf32, #tpu.memory_space<vmem>>, vector<32x1xf32>
    %22 = vector.broadcast %21 : vector<32x1xf32> to vector<32x8xf32>
    %23 = arith.mulf %22, %20 : vector<32x8xf32>
    %cst_8 = arith.constant dense<0.000000e+00> : vector<8xf32>
    %24 = vector.multi_reduction <add>, %23, %cst_8 [0] : vector<32x8xf32> to vector<8xf32>
    %25 = vector.shape_cast %24 : vector<8xf32> to vector<1x8xf32>
    %c0_9 = arith.constant 0 : index
    %c0_10 = arith.constant 0 : index
    %26 = vector.load %arg5[%c0_9, %c0_10] : memref<1x1xf32, #tpu.memory_space<vmem>>, vector<1x1xf32>
    %27 = vector.broadcast %26 : vector<1x1xf32> to vector<1x8xf32>
    %28 = arith.addf %25, %27 : vector<1x8xf32>
    %c0_11 = arith.constant 0 : index
    %c0_12 = arith.constant 0 : index
    %29 = vector.load %arg6[%c0_11, %c0_12] : memref<1x8xf32, #tpu.memory_space<vmem>>, vector<1x8xf32>
    tpu.vector_store %arg6[%c0_11, %c0_12], %28 {strides = array<i32>} : memref<1x8xf32, #tpu.memory_space<vmem>>, vector<1x8xf32>,
    return
  }
  func.func @transform_0(%arg0: i32) -> (i32, i32) {
    %c0_i32 = arith.constant 0 : i32
    %c0_i32_0 = arith.constant 0 : i32
    return %c0_i32, %arg0 : i32, i32
  }
  func.func @transform_1(%arg0: i32) -> (i32, i32) {
    %c0_i32 = arith.constant 0 : i32
    %c0_i32_0 = arith.constant 0 : i32
    %c0_i32_1 = arith.constant 0 : i32
    return %c0_i32, %c0_i32_0 : i32, i32
  }
  func.func @transform_2(%arg0: i32) -> (i32, i32) {
    %c0_i32 = arith.constant 0 : i32
    %c0_i32_0 = arith.constant 0 : i32
    %c0_i32_1 = arith.constant 0 : i32
    return %c0_i32, %c0_i32_0 : i32, i32
  }
  func.func @transform_3(%arg0: i32) -> (i32, i32) {
    %c0_i32 = arith.constant 0 : i32
    %c0_i32_0 = arith.constant 0 : i32
    %c0_i32_1 = arith.constant 0 : i32
    return %c0_i32, %c0_i32_0 : i32, i32
  }
  func.func @transform_4(%arg0: i32) -> (i32, i32) {
    %c0_i32 = arith.constant 0 : i32
    %c0_i32_0 = arith.constant 0 : i32
    %c0_i32_1 = arith.constant 0 : i32
    return %c0_i32, %c0_i32_0 : i32, i32
  }
  func.func @transform_5(%arg0: i32) -> (i32, i32) {
    %c0_i32 = arith.constant 0 : i32
    %c0_i32_0 = arith.constant 0 : i32
    return %c0_i32, %arg0 : i32, i32
  }
}

</mosaic_0001>

<bundles_post_ra>
// kernel: mlp_with_quadratic.1
= control target key start
LH: loop header
LB: loop body
LE: loop exit
PB: predicated region body
PF: predicated region fallthrough
CT: control target
= control target key end

     0   :  { %s337_s0 = inlined_call_operand.vmem [shape: f32[2,8], index: 0, kind: input, shape index: {}]   ;;  %s338_s1 = inlined_call_operand.vmem [shape: f32[32,2], index: 1, kind: input, shape index: {}]   ;;  %s339_s2 = inlined_call_operand.vmem [shape: f32[32,1], index: 2, kind: input, shape index: {}]   ;;  %s340_s3 = inlined_call_operand.vmem [shape: f32[32,1], index: 3, kind: input, shape index: {}]   ;;  %s341_s4 = inlined_call_operand.<no memory space> [shape: f32[1,1], index: 4, kind: input, shape index: {}]   ;;  %s342_s5 = inlined_call_operand.hbm [shape: f32[1,8], index: 5, kind: output, shape index: {}]  }
   0x1   :  { %v10_v0 = vstv %s341_s4 }
   0x2   :  { %11 = vst [vmem:[#allocation2] sm:$0x1] %v10_v0 }
   0x3   :  { %v30_v1 = vld [vmem:[%s338_s1 + $0x10] sm:$0xff]  ;;  %v28_v2 = vld [vmem:[%s338_s1] sm:$0xff]  ;;  %v242_v3 = vmov 0   ;;  %v29_v4 = vld [vmem:[%s338_s1 + $0x8] sm:$0xff] }
   0x4   :  { %205 = vset.pattern.permute.xlu1 %v242_v3  ;;  %204 = vset.pattern.permute.xlu0 %v242_v3  ;;  %v24_v5 = vld [vmem:[%s339_s2] sm:$0xff] }
   0x5   :  { %44 = vperm.xlu1 %205, %v30_v1   ;;  %34 = vperm.xlu0 %204, %v28_v2  }
   0x6   :  { %12 = vsyncpa [#allocation4], 0  ;;  %v25_v6 = vld [vmem:[%s339_s2 + $0x8] sm:$0xff]  ;;  %v243_v7 = vmov 1   ;;  %v31_v8 = vld [vmem:[%s338_s1 + $0x18] sm:$0xff]  ;;  %v52_v16 = vlaneseq  ;;  %vm160_vm0 = vcmask 64512  }
   0x7   :  { %v26_v9 = vld [vmem:[%s339_s2 + $0x10] sm:$0xff]  ;;  %v27_v10 = vld [vmem:[%s339_s2 + $0x18] sm:$0xff]  ;;  %v132_v11 = vld [vmem:[%s340_s3] sm:$0xff]  ;;  %vm185_vm1 = vcmask 57344  }
   0x8   :  { %v133_v12 = vld [vmem:[%s340_s3 + $0x8] sm:$0xff]  ;;  %v134_v13 = vld [vmem:[%s340_s3 + $0x10] sm:$0xff]  ;;  %v135_v15 = vld [vmem:[%s340_s3 + $0x18] sm:$0xff]  ;;  %v314_v17 = vshrl.u32 %v52_v16, 7 }
   0x9   :  { %39 = vperm.xlu0 %204, %v29_v4   ;;  %62 = vperm.xlu1 %205, %v24_v5   ;;  %v174_v14 = vld [vmem:[#allocation2] sm:$0x1] }
   0xa   :  { %v54_v18 = vsub.s32 0, %v314_v17  ;;  %v23_v19 = vld [vmem:[%s337_s0] sm:$0x3]  ;;  %v102_v23 = vsub.s32 1, %v314_v17  ;;  %s244_s0 = smov [#allocation3]  }
   0xb   :  { %s193_s3 = sshll.u32 %s244_s0, 4  ;;  %s194_s3 = int_to_ptr.vmem [resolvable:$true] %s193_s3 }
   0xc   :  { %v55_v22 = vrot.slane %v23_v19, %v54_v18  ;;  %v103_v27 = vrot.slane %v23_v19, %v102_v23  ;;  %s218_s18 = scalar_lea.vmem %s194_s3, 16  ;;  %s222_s19 = scalar_lea.vmem %s194_s3, 32 }
   0xd   :  { %67 = vperm.xlu0 %204, %v25_v6   ;;  %206 = vset.pattern.permute.xlu1 %v243_v7  ;;  %p219_p0 = scmp.ne.s32.totalorder %s194_s3, %s218_s18  ;;  %p223_p1 = scmp.lt.s32.totalorder %s194_s3, %s194_s3 }
   0xe   :  { %85 = vperm.xlu1 %206, %v28_v2   ;;  %p224_p2 = scmp.lt.s32.totalorder %s222_s19, %s218_s18 }
  0x10   :  { %p225_p3 = por %p224_p2, %p223_p1 }
  0x11   :  { %207 = vset.pattern.permute.xlu0 %v243_v7 }
  0x12   :  { %89 = vperm.xlu0 %207, %v29_v4   ;;  %208 = vset.pattern.permute.xlu1 %v242_v3  ;;  %p226_p4 = pnand %p225_p3, %p219_p0 }
  0x13   :  { %49 = vperm.xlu1 %208, %v31_v8  }
  0x16   :  { %93 = vperm.xlu0 %207, %v30_v1  }
  0x17   :  { %72 = vperm.xlu1 %208, %v26_v9  }
  0x1a   :  { %97 = vperm.xlu0 %207, %v31_v8  }
  0x1b   :  { %77 = vperm.xlu1 %208, %v27_v10  }
  0x1e   :  { %209 = vset.pattern.permute.xlu0 %v242_v3 }
  0x1f   :  { %138 = vperm.xlu1 %208, %v132_v11   ;;  %143 = vperm.xlu0 %209, %v133_v12  }
  0x23   :  { %148 = vperm.xlu1 %208, %v134_v13   ;;  %177 = vperm.xlu0 %209, %v174_v14  }
  0x27   :  { %153 = vperm.xlu1 %208, %v135_v15  }
  0x84   :  { %v45_v20 = vpop.permute.xlu1 %44  ;;  %v35_v21 = vpop.permute.xlu0 %34 }
  0x85   :  { %v56_v26 = vmul.f32 %v55_v22, %v35_v21  ;;  %v58_v40 = vmul.f32 %v55_v22, %v45_v20 }
  0x88   :  { %v40_v24 = vpop.permute.xlu0 %39  ;;  %v63_v25 = vpop.permute.xlu1 %62 }
  0x89   :  { %v80_v30 = vadd.f32 %v63_v25, %v56_v26  ;;  %v57_v32 = vmul.f32 %v55_v22, %v40_v24 }
  0x8c   :  { %v68_v28 = vpop.permute.xlu0 %67 }
  0x8d   :  { %v86_v29 = vpop.permute.xlu1 %85  ;;  %v81_v35 = vadd.f32 %v68_v28, %v57_v32 }
  0x8e   :  { %v104_v31 = vmul.f32 %v103_v27, %v86_v29 }
  0x90   :  { %v108_v33 = vadd.f32 %v104_v31, %v80_v30 }
  0x91   :  { %v90_v34 = vpop.permute.xlu0 %89 }
  0x92   :  { %v116_v36 = vand.u32 2147483647, %v108_v33  ;;  %v105_v37 = vmul.f32 %v103_v27, %v90_v34  ;;  %v50_v38 = vpop.permute.xlu1 %49  ;;  %v112_v63 = vmul.f32 %v108_v33, %v108_v33 }
  0x93   :  { %v59_v48 = vmul.f32 %v55_v22, %v50_v38 }
  0x94   :  { %v109_v39 = vadd.f32 %v105_v37, %v81_v35  ;;  %v120_v41 = vadd.f32 1.0, %v116_v36 }
  0x95   :  { %v94_v42 = vpop.permute.xlu0 %93 }
  0x96   :  { %v117_v43 = vand.u32 2147483647, %v109_v39  ;;  %v106_v44 = vmul.f32 %v103_v27, %v94_v42  ;;  %v73_v45 = vpop.permute.xlu1 %72  ;;  %210 = vrcp.f32 %v120_v41  ;;  %v113_v61 = vmul.f32 %v109_v39, %v109_v39 }
  0x97   :  { %v82_v46 = vadd.f32 %v73_v45, %v58_v40 }
  0x98   :  { %v121_v47 = vadd.f32 1.0, %v117_v43 }
  0x99   :  { %v110_v49 = vadd.f32 %v106_v44, %v82_v46  ;;  %v98_v50 = vpop.permute.xlu0 %97 }
  0x9a   :  { %212 = vrcp.f32 %v121_v47  ;;  %v107_v51 = vmul.f32 %v103_v27, %v98_v50  ;;  %v78_v52 = vpop.permute.xlu1 %77 }
  0x9b   :  { %v118_v53 = vand.u32 2147483647, %v110_v49  ;;  %v83_v54 = vadd.f32 %v78_v52, %v59_v48  ;;  %v114_v3 = vmul.f32 %v110_v49, %v110_v49 }
  0x9d   :  { %v122_v55 = vadd.f32 1.0, %v118_v53  ;;  %v111_v56 = vadd.f32 %v107_v51, %v83_v54 }
  0x9e   :  { %v139_v60 = vpop.permute.xlu1 %138  ;;  %v144_v0 = vpop.permute.xlu0 %143 }
  0x9f   :  { %214 = vrcp.f32 %v122_v55  ;;  %v119_v57 = vand.u32 2147483647, %v111_v56  ;;  %v115_v11 = vmul.f32 %v111_v56, %v111_v56 }
  0xa0   :  { %v211_v59 = vpop.eup %210 }
  0xa1   :  { %v123_v58 = vadd.f32 1.0, %v119_v57  ;;  %v128_v2 = vmul.f32 %v211_v59, %v112_v63 }
  0xa2   :  { %v149_v6 = vpop.permute.xlu1 %148  ;;  %v178_v28 = vpop.permute.xlu0 %177 }
  0xa3   :  { %216 = vrcp.f32 %v123_v58  ;;  %v156_v7 = vmul.f32 %v139_v60, %v128_v2  ;;  %v183_v31 = vrot.slane %v178_v28, %v54_v18 }
  0xa4   :  { %v213_v62 = vpop.eup %212 }
  0xa5   :  { %v129_v1 = vmul.f32 %v213_v62, %v113_v61  ;;  %v161_v13 = vsel %vm160_vm0, %v156_v7, 0.0 }
  0xa6   :  { %v154_v19 = vpop.permute.xlu1 %153 }
  0xa7   :  { %v157_v4 = vmul.f32 %v144_v0, %v129_v1 }
  0xa9   :  { %v215_v5 = vpop.eup %214  ;;  %v162_v10 = vsel %vm160_vm0, %v157_v4, 0.0 }
  0xaa   :  { %v130_v8 = vmul.f32 %v215_v5, %v114_v3  ;;  %v163_v16 = vadd.f32 %v162_v10, %v161_v13 }
  0xac   :  { %v158_v9 = vmul.f32 %v149_v6, %v130_v8 }
  0xad   :  { %v217_v12 = vpop.eup %216 }
  0xae   :  { %v164_v14 = vsel %vm160_vm0, %v158_v9, 0.0  ;;  %v131_v15 = vmul.f32 %v217_v12, %v115_v11 }
  0xaf   :  { %v165_v21 = vadd.f32 %v164_v14, %v163_v16 }
  0xb0   :  { %v159_v20 = vmul.f32 %v154_v19, %v131_v15 }
  0xb2   :  { %v166_v22 = vsel %vm160_vm0, %v159_v20, 0.0 }
  0xb3   :  { %v167_v23 = vadd.f32 %v166_v22, %v165_v21 }
  0xb5   :  { %v168_v24 = vrot.slane %v167_v23, 4 }
  0xb7   :  { %v169_v25 = vadd.f32 %v168_v24, %v167_v23 }
  0xb9   :  { %v170_v26 = vrot.slane %v169_v25, 2 }
  0xbb   :  { %v171_v27 = vadd.f32 %v170_v26, %v169_v25 }
  0xbd   :  { %v172_v29 = vrot.slane %v171_v27, 1 }
  0xbf   :  { %v173_v30 = vadd.f32 %v172_v29, %v171_v27 }
  0xc1   :  { %v184_v32 = vadd.f32 %v183_v31, %v173_v30 }
  0xc3   :  { %186 = vst.msk [vmem:[#allocation3] sm:$0x1] %vm185_vm1, %v184_v32 }
  0xc4   :  { %229 = shalt.err (!%p226_p4)
}
  0xc5   :  { %s230_s22 = scalar_lea.hbm %s342_s5, 16 }
  0xc6   :  { %p231_p5 = scmp.ne.s32.totalorder %s342_s5, %s230_s22  ;;  %p234_p6 = scmp.lt.u32.totalorder %s230_s22, %s342_s5 }
  0xc8   :  { %p236_p7 = pnand %p234_p6, %p231_p5 }
  0xca   :  { %239 = shalt.err (!%p236_p7)
}
  0xcb   :  { %196 = dma.vmem_to_hbm [thread:$0]  %s194_s3, 16, %s342_s5, [#allocation4]  }
  0xcc   :  { %240 = dma.done.wait [#allocation4], 16  }
  0xcd   :  { %241 = vsyncadd [#allocation4], 4294967280 }
  0xce   :  { %200 = vsyncpa [#allocation4], 1 }

</bundles_post_ra>
